<compile_context>
chip_gen: v5e
topology: v5e:2x2
jax: 0.10.0
libtpu: 0.0.40
codegen_flags: <defaults>
</compile_context>

<pallas_src>
import numpy as np
import jax
import jax.numpy as jnp
from jax.experimental import pallas as pl
from jax.experimental.pallas import tpu as pltpu


def _round_up(v, m):
    return (v + m - 1) // m * m


def _pad_gate_cols(w, H, Hp):
    """(..., 4H) -> (..., 4Hp): PyTorch gate block k (i,f,g,o) lands at k*Hp."""
    if H == Hp:
        return w
    pad = [(0, 0)] * (w.ndim - 1) + [(0, Hp - H)]
    parts = [jnp.pad(w[..., k * H:(k + 1) * H], pad) for k in range(4)]
    return jnp.concatenate(parts, axis=-1)


def _vmem_capacity_bytes():
    try:
        return int(pltpu.get_tpu_info().vmem_capacity_bytes)
    except Exception:
        return 64 << 20          # conservative default (v7x per-TC VMEM)


# ----------------------------- Pallas kernel --------------------------------
def _bilstm_kernel(nsteps_ref, lens_ref, emb_ref, wih_f_ref, whh_ref,
                   xlast_ref, wih_b_ref, out_ref, h_scr, c_scr, lens_scr):
    """Masked forward-LSTM recurrence + backward single-step output.

    nsteps_ref : (nb,)        i32 SMEM  per-tile max valid length (scalar prefetch)
    lens_ref   : (tB, 1)      i32       valid length per row
    emb_ref    : (T, tB, E+1) f32       time-major embeddings, last column == 1
    wih_f_ref  : (E+1, 4Hp)   f32       [W_ih_f ; b_f]   (resident)
    whh_ref    : (Hp, 4Hp)    f32       W_hh_f           (resident)
    xlast_ref  : (tB, E+1)    f32       embedding of last valid token, +1 column
    wih_b_ref  : (E+1, 4Hp)   f32       [W_ih_b ; b_b]   (resident)
    out_ref    : (tB, 2Hp)    f32       [h_fwd(last valid) | h_bwd(at last valid)]
    scratch    : h_scr, c_scr (tB, Hp) f32 ; lens_scr (tB, Hp) i32
    Padded gate columns / hidden rows are exactly zero by construction (zero
    weight/bias columns -> sigmoid(0)*tanh(0) = 0), so they never contaminate
    the valid lanes.
    """
    tB, Hp = h_scr.shape

    # Per-tile recurrence length (words are sorted by length in the wrapper, so
    # fully padded trailing steps are skipped entirely).
    nsteps = nsteps_ref[pl.program_id(0)]

    h_scr[...] = jnp.zeros_like(h_scr)
    c_scr[...] = jnp.zeros_like(c_scr)
    # Hoist the validity-mask lane broadcast out of the serial T loop.
    lens_scr[...] = jnp.broadcast_to(lens_ref[...], (tB, Hp))

    def step(t, carry):
        xt = emb_ref[t]                          # (tB, E+1); last col = 1 (bias)
        h = h_scr[...]
        c = c_scr[...]
        # Input projection fused with the recurrent projection; weights are read
        # inside the dots so no (Hp, 4Hp) value is pinned in vregs across steps.
        gates = (jnp.dot(xt, wih_f_ref[...], preferred_element_type=jnp.float32)
                 + jnp.dot(h, whh_ref[...], preferred_element_type=jnp.float32))
        i_g = jax.nn.sigmoid(gates[:, 0 * Hp:1 * Hp])   # lane-aligned slices
        f_g = jax.nn.sigmoid(gates[:, 1 * Hp:2 * Hp])
        g_g = jnp.tanh(gates[:, 2 * Hp:3 * Hp])
        o_g = jax.nn.sigmoid(gates[:, 3 * Hp:4 * Hp])
        c_new = f_g * c + i_g * g_g
        h_new = o_g * jnp.tanh(c_new)
        valid = t < lens_scr[...]                # compare + 2 selects only
        h_scr[...] = jnp.where(valid, h_new, h)
        c_scr[...] = jnp.where(valid, c_new, c)
        return carry

    jax.lax.fori_loop(0, nsteps, step, 0)

    # Backward direction at position lens-1 == one step from zero state (forget
    # gate multiplies c0 = 0 and W_hh_b sees h0 = 0, so both drop out).
    gb = jnp.dot(xlast_ref[...], wih_b_ref[...], preferred_element_type=jnp.float32)
    ib = jax.nn.sigmoid(gb[:, 0 * Hp:1 * Hp])
    gg = jnp.tanh(gb[:, 2 * Hp:3 * Hp])
    ob = jax.nn.sigmoid(gb[:, 3 * Hp:4 * Hp])
    hb = ob * jnp.tanh(ib * gg)
    hb = jnp.where(lens_ref[...] > 0, hb, 0.0)   # empty words / batch-pad rows

    # Two lane-aligned stores instead of a concatenated temp.
    out_ref[:, 0:Hp] = h_scr[...]
    out_ref[:, Hp:2 * Hp] = hb


# ------------------------------ Wrapper --------------------------------------
def _pick_batch_tile(B, T, Hp, E):
    """Largest multiple-of-8 batch tile fitting ~half of this generation's VMEM
    (64 MiB budget on 128 MiB parts, 32 MiB on v7x), forcing >=2 grid steps when
    the batch allows it (v7x megacore occupancy)."""
    cap = _vmem_capacity_bytes()
    budget = min(cap // 2, 64 << 20)
    lanes_e = _round_up(E + 1, 128)
    per_row = 4 * (2 * (T * lanes_e          # emb tile (double-buffered)
                        + 128                # lens tile
                        + lanes_e            # xlast tile
                        + 2 * Hp)            # out tile
                   + 3 * Hp)                 # h / c / lens scratch
    weight_bytes = 4 * 2 * (2 * _round_up(E + 1, 8) + Hp) * 4 * Hp
    tB = ((budget - weight_bytes) // max(per_row, 1)) // 8 * 8
    tB = int(max(8, min(tB, 1024)))
    Bp = _round_up(B, 8)
    tB = min(tB, Bp)
    if Bp > 8 and tB >= Bp:                  # keep >= 2 grid steps for megacore
        tB = max(8, _round_up(Bp // 2, 8))
    return tB


def char_lstm_d_forward(x, params, pad_index=0):
    """x: (B, T) int32 char ids.  Returns (B, n_out) f32."""
    B, T = x.shape
    E = params["embed"].shape[1]
    H = params["whh_f"].shape[0]
    Hp = _round_up(H, 128)                       # lane-aligned hidden size

    # Glue: mask / lengths (valid tokens assumed to form a contiguous prefix,
    # matching pack_padded_sequence semantics).
    mask = x != pad_index
    lens = mask.sum(axis=1).astype(jnp.int32)    # (B,)
    # TODO(synk): IndependentDropout / SharedDropout / BiLSTM variational dropout
    # are stochastic training-only ops; treated as identity (eval mode).

    # Sort words by length (descending) so per-tile loop bounds are tight.
    order = jnp.argsort(-lens)
    inv = jnp.argsort(order)
    x_s = x[order]
    lens_s = lens[order]

    # Lane-aligned (Hp-padded) weights; zero pad columns keep padded lanes at 0.
    wih_f = _pad_gate_cols(params["wih_f"], H, Hp)                                   # (E, 4Hp)
    whh_f = _pad_gate_cols(jnp.pad(params["whh_f"], ((0, Hp - H), (0, 0))), H, Hp)   # (Hp, 4Hp)
    b_f = _pad_gate_cols(params["b_f"], H, Hp)                                       # (1, 4Hp)
    wih_b = _pad_gate_cols(params["wih_b"], H, Hp)                                   # (E, 4Hp)
    b_b = _pad_gate_cols(params["b_b"], H, Hp)                                       # (1, 4Hp)
    # Fold biases into the input projection via an augmented ones column.
    wih_f_aug = jnp.concatenate([wih_f, b_f], axis=0)                                # (E+1, 4Hp)
    wih_b_aug = jnp.concatenate([wih_b, b_b], axis=0)                                # (E+1, 4Hp)

    # Batch (word) tiling: sublane-aligned, VMEM-budgeted, megacore-friendly.
    tB = _pick_batch_tile(B, T, Hp, E)
    Bp = _round_up(B, tB)
    nb = Bp // tB

    x_p = jnp.pad(x_s, ((0, Bp - B), (0, 0)), constant_values=pad_index)
    lens_p = jnp.pad(lens_s, (0, Bp - B))        # padded rows get lens = 0

    # Time-major embedding gather (+ ones column for the folded bias). Much
    # smaller than the previously materialized (T, B, 4Hp) gates tensor.
    emb_tm = jnp.take(params["embed"], x_p.T, axis=0)                               # (T, Bp, E)
    emb_tm = jnp.concatenate([emb_tm, jnp.ones((T, Bp, 1), jnp.float32)], axis=-1)  # (T, Bp, E+1)

    # Embedding of the last valid token per word (backward direction input).
    idx = jnp.maximum(lens_s - 1, 0)
    xlast = jnp.take_along_axis(jnp.take(params["embed"], x_s, axis=0),
                                idx[:, None, None], axis=1)[:, 0]                   # (B, E)
    xlast = jnp.concatenate([xlast, jnp.ones((B, 1), jnp.float32)], axis=-1)        # (B, E+1)
    xlast_p = jnp.pad(xlast, ((0, Bp - B), (0, 0)))                                 # (Bp, E+1)

    # Per-tile recurrence bound (scalar-prefetched into SMEM).
    nsteps = jnp.max(lens_p.reshape(nb, tB), axis=1).astype(jnp.int32)              # (nb,)

    # VMEM: double-buffered tiles + resident weights + scratch, plus headroom;
    # never request the whole physical pool.
    lanes_e = _round_up(E + 1, 128)
    tile_bytes = 4 * (2 * (T * tB * lanes_e + tB * 128 + tB * lanes_e + tB * 2 * Hp)
                      + 3 * tB * Hp)
    weight_bytes = 4 * 2 * (2 * _round_up(E + 1, 8) + Hp) * 4 * Hp
    vmem_limit = int(min(max(tile_bytes + weight_bytes + (8 << 20), 16 << 20),
                         int(_vmem_capacity_bytes() * 0.85)))

    grid_spec = pltpu.PrefetchScalarGridSpec(
        num_scalar_prefetch=1,
        grid=(nb,),
        in_specs=[
            pl.BlockSpec((tB, 1), lambda i, ns: (i, 0)),               # lens
            pl.BlockSpec((T, tB, E + 1), lambda i, ns: (0, i, 0)),     # emb (time-major)
            pl.BlockSpec((E + 1, 4 * Hp), lambda i, ns: (0, 0)),       # [W_ih_f ; b_f]
            pl.BlockSpec((Hp, 4 * Hp), lambda i, ns: (0, 0)),          # W_hh_f
            pl.BlockSpec((tB, E + 1), lambda i, ns: (i, 0)),           # xlast
            pl.BlockSpec((E + 1, 4 * Hp), lambda i, ns: (0, 0)),       # [W_ih_b ; b_b]
        ],
        out_specs=pl.BlockSpec((tB, 2 * Hp), lambda i, ns: (i, 0)),
        scratch_shapes=[pltpu.VMEM((tB, Hp), jnp.float32),             # h (forward)
                        pltpu.VMEM((tB, Hp), jnp.float32),             # c (forward)
                        pltpu.VMEM((tB, Hp), jnp.int32)],              # broadcast lens
    )

    out_p = pl.pallas_call(
        _bilstm_kernel,
        out_shape=jax.ShapeDtypeStruct((Bp, 2 * Hp), jnp.float32),
        grid_spec=grid_spec,
        compiler_params=pltpu.CompilerParams(
            dimension_semantics=("parallel",),      # 2x on v7x megacore when nb >= 2
            vmem_limit_bytes=vmem_limit),
    )(nsteps, lens_p[:, None], emb_tm, wih_f_aug, whh_f, xlast_p, wih_b_aug)

    # Un-pad (forward half at [0:H], backward half at [Hp:Hp+H]) and un-sort.
    out_sorted = jnp.concatenate([out_p[:B, 0:H], out_p[:B, Hp:Hp + H]], axis=-1)
    return out_sorted[inv]


# ------------------------- Deterministic parameters ---------------------------
def make_params(n_chars, n_embed, n_out, key):
    H = n_out // 2
    k_emb, k0, k1, k2, k3, k4, k5, k6, k7 = jax.random.split(key, 9)
    bound = 1.0 / np.sqrt(H)

    def u(k, shape):
        return jax.random.uniform(k, shape, jnp.float32, -bound, bound)

    embed = jax.random.normal(k_emb, (n_chars, n_embed), jnp.float32)
    # PyTorch layout: weight_ih (4H, E), weight_hh (4H, H), biases (4H,)
    wih_f = u(k0, (4 * H, n_embed));  whh_f = u(k1, (4 * H, H))
    bih_f = u(k2, (4 * H,));          bhh_f = u(k3, (4 * H,))
    wih_b = u(k4, (4 * H, n_embed));  whh_b = u(k5, (4 * H, H))
    bih_b = u(k6, (4 * H,));          bhh_b = u(k7, (4 * H,))

    return {
        "embed": embed,
        # transposed for x @ W; biases combined
        "wih_f": wih_f.T, "whh_f": whh_f.T, "b_f": (bih_f + bhh_f)[None, :],
        "wih_b": wih_b.T, "whh_b": whh_b.T, "b_b": (bih_b + bhh_b)[None, :],
    }


# --------------------------- Pure-numpy reference -----------------------------
def reference_forward(x, params, pad_index=0):
    x = np.asarray(x)
    embed = np.asarray(params["embed"])
    wih_f = np.asarray(params["wih_f"]); whh_f = np.asarray(params["whh_f"])
    b_f = np.asarray(params["b_f"])[0]
    wih_b = np.asarray(params["wih_b"]); whh_b = np.asarray(params["whh_b"])
    b_b = np.asarray(params["b_b"])[0]
    H = whh_f.shape[0]
    B, T = x.shape

    def sig(v):
        return 1.0 / (1.0 + np.exp(-v))

    def cell(xt, h, c, wih, whh, b):
        g = xt @ wih + h @ whh + b
        i, f, gg, o = g[:H], g[H:2 * H], g[2 * H:3 * H], g[3 * H:]
        c_new = sig(f) * c + sig(i) * np.tanh(gg)
        return sig(o) * np.tanh(c_new), c_new

    out = np.zeros((B, 2 * H), np.float32)
    for b in range(B):
        L = int((x[b] != pad_index).sum())
        emb = embed[x[b]]
        h = np.zeros(H, np.float32); c = np.zeros(H, np.float32)
        for t in range(L):
            h, c = cell(emb[t], h, c, wih_f, whh_f, b_f)
        h_fwd_last = h
        h = np.zeros(H, np.float32); c = np.zeros(H, np.float32)
        h_bwd_at_last = None
        for t in range(L - 1, -1, -1):
            h, c = cell(emb[t], h, c, wih_b, whh_b, b_b)
            if t == L - 1:
                h_bwd_at_last = h.copy()
        out[b] = np.concatenate([h_fwd_last, h_bwd_at_last])
    return out


# ---------------------------------- Main --------------------------------------
if __name__ == "__main__":
    n_chars, n_embed, n_out, pad_index = 20, 16, 32, 0
    B, T = 2, 8

    key = jax.random.PRNGKey(0)
    k_params, k_x = jax.random.split(key)
    params = make_params(n_chars, n_embed, n_out, k_params)

    # char ids with contiguous valid prefixes (lens = [8, 5]), padded with 0
    x = jax.random.randint(k_x, (B, T), 1, n_chars, dtype=jnp.int32)
    lens = jnp.array([T, 5], dtype=jnp.int32)
    x = jnp.where(jnp.arange(T)[None, :] < lens[:, None], x, pad_index)

    hidden = char_lstm_d_forward(x, params, pad_index)
    hidden = jax.block_until_ready(hidden)

    ref = reference_forward(x, params, pad_index)
    np.testing.assert_allclose(np.asarray(hidden), ref, rtol=5e-5, atol=5e-5)
    print("KERNEL_OK")
</pallas_src>

<mosaic_0001>
module attributes {stable_mosaic.version = 11 : i64} {
  func.func @_bilstm_kernel(%arg0: i32, %arg1: memref<1xi32, #tpu.memory_space<smem>>, %arg2: memref<8x1xi32, #tpu.memory_space<vmem>>, %arg3: memref<8x8x17xf32, #tpu.memory_space<vmem>>, %arg4: memref<17x512xf32, #tpu.memory_space<vmem>>, %arg5: memref<128x512xf32, #tpu.memory_space<vmem>>, %arg6: memref<8x17xf32, #tpu.memory_space<vmem>>, %arg7: memref<17x512xf32, #tpu.memory_space<vmem>>, %arg8: memref<8x256xf32, #tpu.memory_space<vmem>>, %arg9: memref<8x128xf32, #tpu.memory_space<vmem>>, %arg10: memref<8x128xf32, #tpu.memory_space<vmem>>, %arg11: memref<8x128xi32, #tpu.memory_space<vmem>>) attributes {dimension_semantics = [#tpu.dimension_semantics<parallel>], iteration_bounds = array<i64: 1>, scalar_prefetch = 1 : i64, scratch_operands = 3 : i64, tpu.core_type = #tpu.core_type<tc>, window_params = [{transform_indices = @transform_0, window_bounds = array<i64: 8, 1>}, {transform_indices = @transform_1, window_bounds = array<i64: 8, 8, 17>}, {pipeline_mode = #tpu.pipeline_mode<synchronous>, transform_indices = @transform_2, window_bounds = array<i64: 17, 512>}, {pipeline_mode = #tpu.pipeline_mode<synchronous>, transform_indices = @transform_3, window_bounds = array<i64: 128, 512>}, {transform_indices = @transform_4, window_bounds = array<i64: 8, 17>}, {pipeline_mode = #tpu.pipeline_mode<synchronous>, transform_indices = @transform_5, window_bounds = array<i64: 17, 512>}, {transform_indices = @transform_6, window_bounds = array<i64: 8, 256>}]} {
    %0 = arith.index_cast %arg0 : i32 to index
    %1 = memref.load %arg1[%0] : memref<1xi32, #tpu.memory_space<smem>>
    %cst = arith.constant 0.000000e+00 : f32
    %2 = vector.broadcast %cst : f32 to vector<8x128xf32>
    %c0 = arith.constant 0 : index
    %c0_0 = arith.constant 0 : index
    %3 = vector.load %arg9[%c0, %c0_0] : memref<8x128xf32, #tpu.memory_space<vmem>>, vector<8x128xf32>
    tpu.vector_store %arg9[%c0, %c0_0], %2 {strides = array<i32>} : memref<8x128xf32, #tpu.memory_space<vmem>>, vector<8x128xf32>,
    %cst_1 = arith.constant 0.000000e+00 : f32
    %4 = vector.broadcast %cst_1 : f32 to vector<8x128xf32>
    %c0_2 = arith.constant 0 : index
    %c0_3 = arith.constant 0 : index
    %5 = vector.load %arg10[%c0_2, %c0_3] : memref<8x128xf32, #tpu.memory_space<vmem>>, vector<8x128xf32>
    tpu.vector_store %arg10[%c0_2, %c0_3], %4 {strides = array<i32>} : memref<8x128xf32, #tpu.memory_space<vmem>>, vector<8x128xf32>,
    %c0_4 = arith.constant 0 : index
    %c0_5 = arith.constant 0 : index
    %6 = vector.load %arg2[%c0_4, %c0_5] : memref<8x1xi32, #tpu.memory_space<vmem>>, vector<8x1xi32>
    %7 = vector.shape_cast %6 : vector<8x1xi32> to vector<8x1xi32>
    %8 = vector.broadcast %7 : vector<8x1xi32> to vector<8x128xi32>
    %c0_6 = arith.constant 0 : index
    %c0_7 = arith.constant 0 : index
    %9 = vector.load %arg11[%c0_6, %c0_7] : memref<8x128xi32, #tpu.memory_space<vmem>>, vector<8x128xi32>
    tpu.vector_store %arg11[%c0_6, %c0_7], %8 {strides = array<i32>} : memref<8x128xi32, #tpu.memory_space<vmem>>, vector<8x128xi32>,
    %c0_i32 = arith.constant 0 : i32
    %c0_i32_8 = arith.constant 0 : i32
    %10 = arith.subi %1, %c0_i32_8 : i32
    %11 = arith.addi %c0_i32_8, %10 : i32
    %c1_i32 = arith.constant 1 : i32
    scf.for %arg12 = %c0_i32_8 to %11 step %c1_i32  : i32 {
      %42 = arith.index_cast %arg12 : i32 to index
      %c0_25 = arith.constant 0 : index
      %c0_26 = arith.constant 0 : index
      %43 = vector.load %arg3[%42, %c0_25, %c0_26] : memref<8x8x17xf32, #tpu.memory_space<vmem>>, vector<1x8x17xf32>
      %44 = vector.shape_cast %43 : vector<1x8x17xf32> to vector<8x17xf32>
      %c0_27 = arith.constant 0 : index
      %c0_28 = arith.constant 0 : index
      %45 = vector.load %arg9[%c0_27, %c0_28] : memref<8x128xf32, #tpu.memory_space<vmem>>, vector<8x128xf32>
      %c0_29 = arith.constant 0 : index
      %c0_30 = arith.constant 0 : index
      %46 = vector.load %arg10[%c0_29, %c0_30] : memref<8x128xf32, #tpu.memory_space<vmem>>, vector<8x128xf32>
      %c0_31 = arith.constant 0 : index
      %c0_32 = arith.constant 0 : index
      %47 = vector.load %arg4[%c0_31, %c0_32] : memref<17x512xf32, #tpu.memory_space<vmem>>, vector<17x512xf32>
      %cst_33 = arith.constant dense<0.000000e+00> : vector<8x512xf32>
      %48 = tpu.matmul %44, %47, %cst_33 {dimension_numbers = #tpu.dot_dimension_numbers<[1], [0], [0], [1], [0, 0, 1, 1], [], []>} : vector<8x17xf32>, vector<17x512xf32>, vector<8x512xf32> -> vector<8x512xf32>
      %c0_34 = arith.constant 0 : index
      %c0_35 = arith.constant 0 : index
      %49 = vector.load %arg5[%c0_34, %c0_35] : memref<128x512xf32, #tpu.memory_space<vmem>>, vector<128x512xf32>
      %cst_36 = arith.constant dense<0.000000e+00> : vector<8x512xf32>
      %50 = tpu.matmul %45, %49, %cst_36 {dimension_numbers = #tpu.dot_dimension_numbers<[1], [0], [0], [1], [0, 0, 1, 1], [], []>} : vector<8x128xf32>, vector<128x512xf32>, vector<8x512xf32> -> vector<8x512xf32>
      %51 = arith.addf %48, %50 : vector<8x512xf32>
      %52 = vector.extract_strided_slice %51 {offsets = [0, 0], sizes = [8, 128], strides = [1, 1]} : vector<8x512xf32> to vector<8x128xf32>
      %53 = arith.negf %52 : vector<8x128xf32>
      %54 = math.exp %53 : vector<8x128xf32>
      %cst_37 = arith.constant 1.000000e+00 : f32
      %55 = vector.broadcast %cst_37 : f32 to vector<8x128xf32>
      %56 = arith.addf %55, %54 : vector<8x128xf32>
      %57 = arith.divf %55, %56 : vector<8x128xf32>
      %58 = vector.extract_strided_slice %51 {offsets = [0, 128], sizes = [8, 128], strides = [1, 1]} : vector<8x512xf32> to vector<8x128xf32>
      %59 = arith.negf %58 : vector<8x128xf32>
      %60 = math.exp %59 : vector<8x128xf32>
      %cst_38 = arith.constant 1.000000e+00 : f32
      %61 = vector.broadcast %cst_38 : f32 to vector<8x128xf32>
      %62 = arith.addf %61, %60 : vector<8x128xf32>
      %63 = arith.divf %61, %62 : vector<8x128xf32>
      %64 = vector.extract_strided_slice %51 {offsets = [0, 256], sizes = [8, 128], strides = [1, 1]} : vector<8x512xf32> to vector<8x128xf32>
      %65 = math.tanh %64 : vector<8x128xf32>
      %66 = vector.extract_strided_slice %51 {offsets = [0, 384], sizes = [8, 128], strides = [1, 1]} : vector<8x512xf32> to vector<8x128xf32>
      %67 = arith.negf %66 : vector<8x128xf32>
      %68 = math.exp %67 : vector<8x128xf32>
      %cst_39 = arith.constant 1.000000e+00 : f32
      %69 = vector.broadcast %cst_39 : f32 to vector<8x128xf32>
      %70 = arith.addf %69, %68 : vector<8x128xf32>
      %71 = arith.divf %69, %70 : vector<8x128xf32>
      %72 = arith.mulf %63, %46 : vector<8x128xf32>
      %73 = arith.mulf %57, %65 : vector<8x128xf32>
      %74 = arith.addf %72, %73 : vector<8x128xf32>
      %75 = math.tanh %74 : vector<8x128xf32>
      %76 = arith.mulf %71, %75 : vector<8x128xf32>
      %c0_40 = arith.constant 0 : index
      %c0_41 = arith.constant 0 : index
      %77 = vector.load %arg11[%c0_40, %c0_41] : memref<8x128xi32, #tpu.memory_space<vmem>>, vector<8x128xi32>
      %78 = vector.broadcast %arg12 : i32 to vector<8x128xi32>
      %79 = arith.cmpi slt, %78, %77 : vector<8x128xi32>
      %80 = arith.select %79, %76, %45 : vector<8x128xi1>, vector<8x128xf32>
      %c0_42 = arith.constant 0 : index
      %c0_43 = arith.constant 0 : index
      %81 = vector.load %arg9[%c0_42, %c0_43] : memref<8x128xf32, #tpu.memory_space<vmem>>, vector<8x128xf32>
      tpu.vector_store %arg9[%c0_42, %c0_43], %80 {strides = array<i32>} : memref<8x128xf32, #tpu.memory_space<vmem>>, vector<8x128xf32>,
      %82 = arith.select %79, %74, %46 : vector<8x128xi1>, vector<8x128xf32>
      %c0_44 = arith.constant 0 : index
      %c0_45 = arith.constant 0 : index
      %83 = vector.load %arg10[%c0_44, %c0_45] : memref<8x128xf32, #tpu.memory_space<vmem>>, vector<8x128xf32>
      tpu.vector_store %arg10[%c0_44, %c0_45], %82 {strides = array<i32>} : memref<8x128xf32, #tpu.memory_space<vmem>>, vector<8x128xf32>,
    }
    %c0_9 = arith.constant 0 : index
    %c0_10 = arith.constant 0 : index
    %12 = vector.load %arg6[%c0_9, %c0_10] : memref<8x17xf32, #tpu.memory_space<vmem>>, vector<8x17xf32>
    %c0_11 = arith.constant 0 : index
    %c0_12 = arith.constant 0 : index
    %13 = vector.load %arg7[%c0_11, %c0_12] : memref<17x512xf32, #tpu.memory_space<vmem>>, vector<17x512xf32>
    %cst_13 = arith.constant dense<0.000000e+00> : vector<8x512xf32>
    %14 = tpu.matmul %12, %13, %cst_13 {dimension_numbers = #tpu.dot_dimension_numbers<[1], [0], [0], [1], [0, 0, 1, 1], [], []>} : vector<8x17xf32>, vector<17x512xf32>, vector<8x512xf32> -> vector<8x512xf32>
    %15 = vector.extract_strided_slice %14 {offsets = [0, 0], sizes = [8, 128], strides = [1, 1]} : vector<8x512xf32> to vector<8x128xf32>
    %16 = arith.negf %15 : vector<8x128xf32>
    %17 = math.exp %16 : vector<8x128xf32>
    %cst_14 = arith.constant 1.000000e+00 : f32
    %18 = vector.broadcast %cst_14 : f32 to vector<8x128xf32>
    %19 = arith.addf %18, %17 : vector<8x128xf32>
    %20 = arith.divf %18, %19 : vector<8x128xf32>
    %21 = vector.extract_strided_slice %14 {offsets = [0, 256], sizes = [8, 128], strides = [1, 1]} : vector<8x512xf32> to vector<8x128xf32>
    %22 = math.tanh %21 : vector<8x128xf32>
    %23 = vector.extract_strided_slice %14 {offsets = [0, 384], sizes = [8, 128], strides = [1, 1]} : vector<8x512xf32> to vector<8x128xf32>
    %24 = arith.negf %23 : vector<8x128xf32>
    %25 = math.exp %24 : vector<8x128xf32>
    %cst_15 = arith.constant 1.000000e+00 : f32
    %26 = vector.broadcast %cst_15 : f32 to vector<8x128xf32>
    %27 = arith.addf %26, %25 : vector<8x128xf32>
    %28 = arith.divf %26, %27 : vector<8x128xf32>
    %29 = arith.mulf %20, %22 : vector<8x128xf32>
    %30 = math.tanh %29 : vector<8x128xf32>
    %31 = arith.mulf %28, %30 : vector<8x128xf32>
    %c0_16 = arith.constant 0 : index
    %c0_17 = arith.constant 0 : index
    %32 = vector.load %arg2[%c0_16, %c0_17] : memref<8x1xi32, #tpu.memory_space<vmem>>, vector<8x1xi32>
    %c0_i32_18 = arith.constant 0 : i32
    %33 = vector.broadcast %c0_i32_18 : i32 to vector<8x1xi32>
    %34 = arith.cmpi sgt, %32, %33 : vector<8x1xi32>
    %cst_19 = arith.constant 0.000000e+00 : f32
    %35 = vector.shape_cast %34 : vector<8x1xi1> to vector<8x1xi1>
    %36 = vector.broadcast %35 : vector<8x1xi1> to vector<8x128xi1>
    %37 = vector.broadcast %cst_19 : f32 to vector<8x128xf32>
    %38 = arith.select %36, %31, %37 : vector<8x128xi1>, vector<8x128xf32>
    %c0_20 = arith.constant 0 : index
    %c0_21 = arith.constant 0 : index
    %39 = vector.load %arg9[%c0_20, %c0_21] : memref<8x128xf32, #tpu.memory_space<vmem>>, vector<8x128xf32>
    %c0_22 = arith.constant 0 : index
    %c0_23 = arith.constant 0 : index
    %40 = vector.load %arg8[%c0_22, %c0_23] : memref<8x256xf32, #tpu.memory_space<vmem>>, vector<8x128xf32>
    tpu.vector_store %arg8[%c0_22, %c0_23], %39 {strides = array<i32>} : memref<8x256xf32, #tpu.memory_space<vmem>>, vector<8x128xf32>,
    %c0_24 = arith.constant 0 : index
    %c128 = arith.constant 128 : index
    %41 = vector.load %arg8[%c0_24, %c128] : memref<8x256xf32, #tpu.memory_space<vmem>>, vector<8x128xf32>
    tpu.vector_store %arg8[%c0_24, %c128], %38 {strides = array<i32>} : memref<8x256xf32, #tpu.memory_space<vmem>>, vector<8x128xf32>,
    return
  }
  func.func @transform_0(%arg0: i32, %arg1: memref<1xi32, #tpu.memory_space<smem>>) -> (i32, i32) {
    %c0_i32 = arith.constant 0 : i32
    %c0_i32_0 = arith.constant 0 : i32
    return %arg0, %c0_i32 : i32, i32
  }
  func.func @transform_1(%arg0: i32, %arg1: memref<1xi32, #tpu.memory_space<smem>>) -> (i32, i32, i32) {
    %c0_i32 = arith.constant 0 : i32
    %c0_i32_0 = arith.constant 0 : i32
    %c0_i32_1 = arith.constant 0 : i32
    return %c0_i32, %arg0, %c0_i32_0 : i32, i32, i32
  }
  func.func @transform_2(%arg0: i32, %arg1: memref<1xi32, #tpu.memory_space<smem>>) -> (i32, i32) {
    %c0_i32 = arith.constant 0 : i32
    %c0_i32_0 = arith.constant 0 : i32
    %c0_i32_1 = arith.constant 0 : i32
    return %c0_i32, %c0_i32_0 : i32, i32
  }
  func.func @transform_3(%arg0: i32, %arg1: memref<1xi32, #tpu.memory_space<smem>>) -> (i32, i32) {
    %c0_i32 = arith.constant 0 : i32
    %c0_i32_0 = arith.constant 0 : i32
    %c0_i32_1 = arith.constant 0 : i32
    return %c0_i32, %c0_i32_0 : i32, i32
  }
  func.func @transform_4(%arg0: i32, %arg1: memref<1xi32, #tpu.memory_space<smem>>) -> (i32, i32) {
    %c0_i32 = arith.constant 0 : i32
    %c0_i32_0 = arith.constant 0 : i32
    return %arg0, %c0_i32 : i32, i32
  }
  func.func @transform_5(%arg0: i32, %arg1: memref<1xi32, #tpu.memory_space<smem>>) -> (i32, i32) {
    %c0_i32 = arith.constant 0 : i32
    %c0_i32_0 = arith.constant 0 : i32
    %c0_i32_1 = arith.constant 0 : i32
    return %c0_i32, %c0_i32_0 : i32, i32
  }
  func.func @transform_6(%arg0: i32, %arg1: memref<1xi32, #tpu.memory_space<smem>>) -> (i32, i32) {
    %c0_i32 = arith.constant 0 : i32
    %c0_i32_0 = arith.constant 0 : i32
    return %arg0, %c0_i32 : i32, i32
  }
}

</mosaic_0001>

<bundles_post_ra>
// kernel: tpu_custom_call.1
= control target key start
LH: loop header
LB: loop body
LE: loop exit
PB: predicated region body
PF: predicated region fallthrough
CT: control target
= control target key end

     0   :  { %13 = vsyncpa [#allocation8], 0  ;;  %s913_s0 = inlined_call_operand.<no memory space> [shape: s32[1], index: 0, kind: input, shape index: {}]   ;;  %s914_s1 = inlined_call_operand.vmem [shape: s32[8,1], index: 1, kind: input, shape index: {}]   ;;  %s915_s2 = inlined_call_operand.hbm [shape: f32[8,8,17], index: 2, kind: input, shape index: {}]   ;;  %s916_s3 = inlined_call_operand.hbm [shape: f32[17,512], index: 3, kind: input, shape index: {}]   ;;  %s917_s4 = inlined_call_operand.hbm [shape: f32[128,512], index: 4, kind: input, shape index: {}]   ;;  %s918_s5 = inlined_call_operand.vmem [shape: f32[8,17], index: 5, kind: input, shape index: {}]   ;;  %s919_s6 = inlined_call_operand.hbm [shape: f32[17,512], index: 6, kind: input, shape index: {}]   ;;  %s920_s7 = inlined_call_operand.hbm [shape: f32[8,256], index: 7, kind: output, shape index: {}]  }
   0x1   :  { %14 = vsyncpa [#allocation11], 0 }
   0x2   :  { %15 = vsyncpa [#allocation14], 0  ;;  %s36_s26 = sshll.u32 %s916_s3, 4  ;;  %s37_s26 = int_to_ptr.hbm [resolvable:$true] %s36_s26 }
   0x3   :  { %16 = vsyncpa [#allocation9], 0  ;;  %s800_s27 = smov [#allocation10]   ;;  %s23_s8 = sshll.u32 %s915_s2, 4  ;;  %s24_s8 = int_to_ptr.hbm [resolvable:$true] %s23_s8 }
   0x4   :  { %s38_s28 = sshll.u32 %s800_s27, 4  ;;  %s801_s9 = smov 512   ;;  %s39_s28 = int_to_ptr.vmem [resolvable:$true] %s38_s28 }
   0x5   :  { %s802_s10 = smov 32   ;;  %s803_s11 = smov [#allocation7]  }
   0x6   :  { %44 = dma.hbm_to_vmem [thread:$0]  %s37_s26, 1536, %s39_s28, [#allocation11], %s801_s9, %s801_s9, %s802_s10  }
   0x7   :  { %s25_s12 = sshll.u32 %s803_s11, 4  ;;  %s804_s13 = smov 128   ;;  %s26_s12 = int_to_ptr.vmem [resolvable:$true] %s25_s12 }
   0x8   :  { %s805_s14 = smov 8   ;;  %s49_s16 = sshll.u32 %s917_s4, 4  ;;  %s50_s16 = int_to_ptr.hbm [resolvable:$true] %s49_s16 }
   0x9   :  { %31 = dma.hbm_to_vmem [thread:$0]  %s24_s8, 1024, %s26_s12, [#allocation8], %s804_s13, %s804_s13, %s805_s14  }
   0xa   :  { %s806_s17 = smov [#allocation12]   ;;  %s64_s20 = sshll.u32 %s919_s6, 4  ;;  %s65_s20 = int_to_ptr.hbm [resolvable:$true] %s64_s20 }
   0xb   :  { %s51_s18 = sshll.u32 %s806_s17, 4  ;;  %s807_s21 = smov [#allocation13]   ;;  %s52_s18 = int_to_ptr.vmem [resolvable:$true] %s51_s18 }
   0xc   :  { %57 = dma.hbm_to_vmem [thread:$0]  %s50_s16, 8192, %s52_s18, [#allocation11], %s801_s9, %s801_s9, %s802_s10  }
   0xd   :  { %s66_s22 = sshll.u32 %s807_s21, 4  ;;  %s67_s22 = int_to_ptr.vmem [resolvable:$true] %s66_s22 }
   0xe   :  { %72 = dma.hbm_to_vmem [thread:$0]  %s65_s20, 1536, %s67_s22, [#allocation14], %s801_s9, %s801_s9, %s802_s10  }
   0xf   :  { %788 = dma.done.wait [#allocation8], 1024  }
  0x10   :  { %789 = vsyncadd [#allocation8], 4294966272 }
  0x11   :  { %790 = dma.done.wait [#allocation11], 9728  }
  0x12   :  { %791 = vsyncadd [#allocation11], 4294957568 }
  0x13   :  { %792 = dma.done.wait [#allocation14], 1536  }
  0x14   :  { %793 = vsyncadd [#allocation14], 4294965760  ;;  %v808_v0 = vmov 0.0   ;;  %v809_v1 = vmov 0   ;;  %v92_v2 = vld [vmem:[%s914_s1] sm:$0xff]  ;;  %p594_p0 = scmp.le.s32.totalorder %s913_s0, 0 }
  0x15   :  { %90 = vst [vmem:[#allocation2] sm:$0xff] %v808_v0  ;;  %634 = vset.pattern.permute.xlu0 %v809_v1  ;;  %s870_s25 = smov (!%p594_p0), 0  }
  0x16   :  { %91 = vst [vmem:[#allocation3] sm:$0xff] %v808_v0  ;;  %94 = vperm.xlu0 %634, %v92_v2  }
  0x85   :  { %591 = sbr.rel (%p594_p0) target bundleno = 350 (0x15e), region = 62 }
  0x88   :  { %v95_v3 = vpop.permute.xlu0 %94 }
  0x89   :  { %96 = vst [vmem:[#allocation4] sm:$0xff] %v95_v3 }
  0x8a LB: > { %v180_v4 = vld [vmem:[#allocation12 + $0x1e0] sm:$0xff]  ;;  %v181_v5 = vld [vmem:[#allocation12 + $0x1e8] sm:$0xff]  ;;  %v183_v6 = vld [vmem:[#allocation12 + $0x1f8] sm:$0xff]  ;;  %vm268_vm0 = vcmask 1040384   ;;  %s595_s26 = sshll.u32 %s798_s25, 3  ;;  %vm264_vm1 = vcmask 138240   ;;  %s798_s25 = sphi %s870_s25, %s100_s25  }
  0x8b   : > { %184 = vmatpush.msra.mxu0 %v180_v4  ;;  %204 = vmatpush.msra.mxu1 %v181_v5  ;;  %v176_v7 = vld [vmem:[#allocation12 + $0x1c0] sm:$0xff]  ;;  %v177_v8 = vld [vmem:[#allocation12 + $0x1c8] sm:$0xff]  ;;  %v179_v9 = vld [vmem:[#allocation12 + $0x1d8] sm:$0xff]  ;;  %s104_s27 = scalar_lea.vmem [#allocation7], %s595_s26 }
  0x8c   : > { %244 = vmatpush.msra.mxu3 %v183_v6  ;;  %v172_v10 = vld [vmem:[#allocation12 + $0x1a0] sm:$0xff]  ;;  %v173_v11 = vld [vmem:[#allocation12 + $0x1a8] sm:$0xff]  ;;  %v175_v12 = vld [vmem:[#allocation12 + $0x1b8] sm:$0xff] }
  0x8d   : > { %185 = vmatpush.msra.mxu0 %v176_v7  ;;  %205 = vmatpush.msra.mxu1 %v177_v8  ;;  %v168_v13 = vld [vmem:[#allocation12 + $0x180] sm:$0xff]  ;;  %v169_v14 = vld [vmem:[#allocation12 + $0x188] sm:$0xff]  ;;  %v182_v15 = vld [vmem:[#allocation12 + $0x1f0] sm:$0xff] }
  0x8e   : > { %245 = vmatpush.msra.mxu3 %v179_v9  ;;  %v171_v16 = vld [vmem:[#allocation12 + $0x198] sm:$0xff]  ;;  %v178_v17 = vld [vmem:[#allocation12 + $0x1d0] sm:$0xff]  ;;  %224 = vmatpush.msra.mxu2 %v182_v15  ;;  %v164_v18 = vld [vmem:[#allocation12 + $0x160] sm:$0xff] }
  0x8f   : > { %186 = vmatpush.msra.mxu0 %v172_v10  ;;  %206 = vmatpush.msra.mxu1 %v173_v11  ;;  %v165_v19 = vld [vmem:[#allocation12 + $0x168] sm:$0xff]  ;;  %v167_v20 = vld [vmem:[#allocation12 + $0x178] sm:$0xff]  ;;  %v174_v21 = vld [vmem:[#allocation12 + $0x1b0] sm:$0xff] }
  0x90   : > { %246 = vmatpush.msra.mxu3 %v175_v12  ;;  %225 = vmatpush.msra.mxu2 %v178_v17  ;;  %v160_v22 = vld [vmem:[#allocation12 + $0x140] sm:$0xff]  ;;  %v161_v23 = vld [vmem:[#allocation12 + $0x148] sm:$0xff]  ;;  %v163_v24 = vld [vmem:[#allocation12 + $0x158] sm:$0xff] }
  0x91   : > { %187 = vmatpush.msra.mxu0 %v168_v13  ;;  %207 = vmatpush.msra.mxu1 %v169_v14  ;;  %v170_v25 = vld [vmem:[#allocation12 + $0x190] sm:$0xff]  ;;  %v156_v26 = vld [vmem:[#allocation12 + $0x120] sm:$0xff]  ;;  %v157_v27 = vld [vmem:[#allocation12 + $0x128] sm:$0xff] }
  0x92   : > { %247 = vmatpush.msra.mxu3 %v171_v16  ;;  %226 = vmatpush.msra.mxu2 %v174_v21  ;;  %v159_v28 = vld [vmem:[#allocation12 + $0x138] sm:$0xff]  ;;  %v166_v29 = vld [vmem:[#allocation12 + $0x170] sm:$0xff]  ;;  %v152_v30 = vld [vmem:[#allocation12 + $0x100] sm:$0xff] }
  0x93   : > { %188 = vmatpush.msra.mxu0 %v164_v18  ;;  %208 = vmatpush.msra.mxu1 %v165_v19  ;;  %v153_v31 = vld [vmem:[#allocation12 + $0x108] sm:$0xff]  ;;  %v155_v32 = vld [vmem:[#allocation12 + $0x118] sm:$0xff]  ;;  %v162_v33 = vld [vmem:[#allocation12 + $0x150] sm:$0xff] }
  0x94   : > { %248 = vmatpush.msra.mxu3 %v167_v20  ;;  %227 = vmatpush.msra.mxu2 %v170_v25  ;;  %v148_v34 = vld [vmem:[#allocation12 + $0xe0] sm:$0xff]  ;;  %v149_v35 = vld [vmem:[#allocation12 + $0xe8] sm:$0xff]  ;;  %v151_v36 = vld [vmem:[#allocation12 + $0xf8] sm:$0xff] }
  0x95   : > { %189 = vmatpush.msra.mxu0 %v160_v22  ;;  %209 = vmatpush.msra.mxu1 %v161_v23  ;;  %v158_v37 = vld [vmem:[#allocation12 + $0x130] sm:$0xff]  ;;  %v144_v38 = vld [vmem:[#allocation12 + $0xc0] sm:$0xff]  ;;  %v145_v39 = vld [vmem:[#allocation12 + $0xc8] sm:$0xff] }
  0x96   : > { %249 = vmatpush.msra.mxu3 %v163_v24  ;;  %228 = vmatpush.msra.mxu2 %v166_v29  ;;  %v147_v40 = vld [vmem:[#allocation12 + $0xd8] sm:$0xff]  ;;  %v154_v41 = vld [vmem:[#allocation12 + $0x110] sm:$0xff]  ;;  %v140_v42 = vld [vmem:[#allocation12 + $0xa0] sm:$0xff] }
  0x97   : > { %190 = vmatpush.msra.mxu0 %v156_v26  ;;  %210 = vmatpush.msra.mxu1 %v157_v27  ;;  %v141_v43 = vld [vmem:[#allocation12 + $0xa8] sm:$0xff]  ;;  %v143_v44 = vld [vmem:[#allocation12 + $0xb8] sm:$0xff]  ;;  %v150_v45 = vld [vmem:[#allocation12 + $0xf0] sm:$0xff] }
  0x98   : > { %250 = vmatpush.msra.mxu3 %v159_v28  ;;  %229 = vmatpush.msra.mxu2 %v162_v33  ;;  %v136_v46 = vld [vmem:[#allocation12 + $0x80] sm:$0xff]  ;;  %v137_v47 = vld [vmem:[#allocation12 + $0x88] sm:$0xff]  ;;  %v139_v48 = vld [vmem:[#allocation12 + $0x98] sm:$0xff] }
  0x99   : > { %191 = vmatpush.msra.mxu0 %v152_v30  ;;  %211 = vmatpush.msra.mxu1 %v153_v31  ;;  %v146_v49 = vld [vmem:[#allocation12 + $0xd0] sm:$0xff]  ;;  %v132_v50 = vld [vmem:[#allocation12 + $0x60] sm:$0xff]  ;;  %v133_v51 = vld [vmem:[#allocation12 + $0x68] sm:$0xff] }
  0x9a   : > { %251 = vmatpush.msra.mxu3 %v155_v32  ;;  %230 = vmatpush.msra.mxu2 %v158_v37  ;;  %v135_v52 = vld [vmem:[#allocation12 + $0x78] sm:$0xff]  ;;  %v142_v53 = vld [vmem:[#allocation12 + $0xb0] sm:$0xff]  ;;  %v128_v54 = vld [vmem:[#allocation12 + $0x40] sm:$0xff] }
  0x9b   : > { %192 = vmatpush.msra.mxu0 %v148_v34  ;;  %212 = vmatpush.msra.mxu1 %v149_v35  ;;  %v129_v55 = vld [vmem:[#allocation12 + $0x48] sm:$0xff]  ;;  %v131_v56 = vld [vmem:[#allocation12 + $0x58] sm:$0xff]  ;;  %v138_v57 = vld [vmem:[#allocation12 + $0x90] sm:$0xff] }
  0x9c   : > { %252 = vmatpush.msra.mxu3 %v151_v36  ;;  %231 = vmatpush.msra.mxu2 %v154_v41  ;;  %v124_v58 = vld [vmem:[#allocation12 + $0x20] sm:$0xff]  ;;  %v125_v59 = vld [vmem:[#allocation12 + $0x28] sm:$0xff]  ;;  %v127_v60 = vld [vmem:[#allocation12 + $0x38] sm:$0xff] }
  0x9d   : > { %193 = vmatpush.msra.mxu0 %v144_v38  ;;  %213 = vmatpush.msra.mxu1 %v145_v39  ;;  %v134_v61 = vld [vmem:[#allocation12 + $0x70] sm:$0xff]  ;;  %v120_v62 = vld [vmem:[#allocation12] sm:$0xff]  ;;  %v121_v63 = vld [vmem:[#allocation12 + $0x8] sm:$0xff] }
  0x9e   : > { %253 = vmatpush.msra.mxu3 %v147_v40  ;;  %232 = vmatpush.msra.mxu2 %v150_v45  ;;  %v123_v0 = vld [vmem:[#allocation12 + $0x18] sm:$0xff]  ;;  %v875_v2 = vld [vmem:[#allocation2] sm:$0xff]  ;;  %v116_v3 = vld [vmem:[#allocation10 + $0x40] sm:$0x1] }
  0x9f   : > { %194 = vmatpush.msra.mxu0 %v140_v42  ;;  %214 = vmatpush.msra.mxu1 %v141_v43  ;;  %v117_v4 = vld [vmem:[#allocation10 + $0x48] sm:$0x1]  ;;  %v130_v5 = vld [vmem:[#allocation12 + $0x50] sm:$0xff]  ;;  %v119_v6 = vld [vmem:[#allocation10 + $0x58] sm:$0x1] }
  0xa0   : > { %254 = vmatpush.msra.mxu3 %v143_v44  ;;  %233 = vmatpush.msra.mxu2 %v146_v49  ;;  %v112_v7 = vld [vmem:[#allocation10 + $0x20] sm:$0xff]  ;;  %v113_v8 = vld [vmem:[#allocation10 + $0x28] sm:$0xff]  ;;  %v126_v9 = vld [vmem:[#allocation12 + $0x30] sm:$0xff] }
  0xa1   : > { %195 = vmatpush.msra.mxu0 %v136_v46  ;;  %215 = vmatpush.msra.mxu1 %v137_v47  ;;  %v115_v10 = vld [vmem:[#allocation10 + $0x38] sm:$0xff]  ;;  %v108_v11 = vld [vmem:[#allocation10] sm:$0xff]  ;;  %v109_v12 = vld [vmem:[#allocation10 + $0x8] sm:$0xff] }
  0xa2   : > { %255 = vmatpush.msra.mxu3 %v139_v48  ;;  %234 = vmatpush.msra.mxu2 %v142_v53  ;;  %v122_v13 = vld [vmem:[#allocation12 + $0x10] sm:$0xff]  ;;  %v111_v14 = vld [vmem:[#allocation10 + $0x18] sm:$0xff]  ;;  %v105_v15 = vld [vmem:[%s104_s27] sm:$0xff] }
  0xa3   : > { %196 = vmatpush.msra.mxu0 %v132_v50  ;;  %216 = vmatpush.msra.mxu1 %v133_v51  ;;  %v118_v16 = vld [vmem:[#allocation10 + $0x50] sm:$0x1] }
  0xa4   : > { %256 = vmatpush.msra.mxu3 %v135_v52  ;;  %235 = vmatpush.msra.mxu2 %v138_v57  ;;  %v114_v17 = vld [vmem:[#allocation10 + $0x30] sm:$0xff]  ;;  %v425_v57 = vstv %s798_s25  ;;  %s100_s25 = sadd.s32 1, %s798_s25  }
  0xa5   : > { %197 = vmatpush.msra.mxu0 %v128_v54  ;;  %217 = vmatpush.msra.mxu1 %v129_v55  ;;  %v110_v18 = vld [vmem:[#allocation10 + $0x10] sm:$0xff]  ;;  %p99_p1 = scmp.ge.s32.totalorder %s100_s25, %s913_s0 }
  0xa6   : > { %257 = vmatpush.msra.mxu3 %v131_v56  ;;  %236 = vmatpush.msra.mxu2 %v134_v61 }
  0xa7   : > { %198 = vmatpush.msra.mxu0 %v124_v58  ;;  %218 = vmatpush.msra.mxu1 %v125_v59  ;;  %v107_v59 = vld [vmem:[#allocation3] sm:$0xff] }
  0xa8   : > { %258 = vmatpush.msra.mxu3 %v127_v60  ;;  %237 = vmatpush.msra.mxu2 %v130_v5 }
  0xa9   : > { %199 = vmatpush.msra.mxu0 %v120_v62  ;;  %219 = vmatpush.msra.mxu1 %v121_v63  ;;  %v424_v62 = vld [vmem:[#allocation4] sm:$0xff] }
  0xaa   : > { %259 = vmatpush.msra.mxu3 %v123_v0  ;;  %200 = vmatmul.f32.vlgmr.msra.gmra.mxu0 %v875_v2  ;;  %vm887_vm10 = vcmp.lt.s32.totalorder %v425_v57, %v424_v62 }
  0xab   : > { %220 = vmatmul.f32.vlgmr.msra.gmra.mxu1 %v875_v2  ;;  %260 = vmatmul.f32.vlgmr.msra.gmra.mxu3 %v875_v2 }
  0xac   : > { %596 = vmatpush.msk.msrb.mxu0 %vm268_vm0, %v116_v3  ;;  %598 = vmatpush.msk.msrb.mxu1 %vm268_vm0, %v117_v4 }
  0xad   : > { %602 = vmatpush.msk.msrb.mxu3 %vm268_vm0, %v119_v6  ;;  %238 = vmatpush.msra.mxu2 %v126_v9 }
  0xae   : > { %295 = vmatpush.msrb.mxu0 %v112_v7  ;;  %315 = vmatpush.msrb.mxu1 %v113_v8 }
  0xaf   : > { %355 = vmatpush.msrb.mxu3 %v115_v10  ;;  %239 = vmatpush.msra.mxu2 %v122_v13 }
  0xb0   : > { %296 = vmatpush.msrb.mxu0 %v108_v11  ;;  %316 = vmatpush.msrb.mxu1 %v109_v12 }
  0xb1   : > { %356 = vmatpush.msrb.mxu3 %v111_v14  ;;  %240 = vmatmul.f32.vlgmr.msra.gmra.mxu2 %v875_v2 }
  0xb2   : > { %597 = vmatmul.msk.f32.vlgmr.msrb.gmra.mxu0 %vm264_vm1, %v105_v15  ;;  %600 = vmatpush.msk.msrb.mxu2 %vm268_vm0, %v118_v16 }
  0xb3   : > { %599 = vmatmul.msk.f32.vlgmr.msrb.gmra.mxu1 %vm264_vm1, %v105_v15  ;;  %603 = vmatmul.msk.f32.vlgmr.msrb.gmra.mxu3 %vm264_vm1, %v105_v15 }
  0xb4   : > { %335 = vmatpush.msrb.mxu2 %v114_v17 }
  0xb6   : > { %336 = vmatpush.msrb.mxu2 %v110_v18 }
  0xb9   : > { %601 = vmatmul.msk.f32.vlgmr.msrb.gmra.mxu2 %vm264_vm1, %v105_v15 }
 0x127   : > { %v201_v19 = vpop.f32.mrf.mxu0 }
 0x128   : > { %v221_v20 = vpop.f32.mrf.mxu1 }
 0x12e   : > { %v261_v21 = vpop.f32.mrf.mxu3 }
 0x12f   : > { %v298_v22 = vpop.f32.mrf.mxu0 }
 0x130   : > { %v299_v23 = vadd.f32 %v298_v22, %v201_v19  ;;  %v318_v24 = vpop.f32.mrf.mxu1 }
 0x131   : > { %v319_v25 = vadd.f32 %v318_v24, %v221_v20 }
 0x132   : > { %v604_v26 = vmul.f32 -1.442695, %v299_v23 }
 0x133   : > { %v605_v27 = vmul.f32 -1.442695, %v319_v25 }
 0x134   : > { %635 = vpow2.f32 %v604_v26  ;;  %v241_v28 = vpop.f32.mrf.mxu2 }
 0x135   : > { %637 = vpow2.f32 %v605_v27 }
 0x136   : > { %v358_v29 = vpop.f32.mrf.mxu3 }
 0x137   : > { %v359_v30 = vadd.f32 %v358_v29, %v261_v21 }
 0x139   : > { %v606_v31 = vmul.f32 -1.442695, %v359_v30 }
 0x13a   : > { %v636_v32 = vpop.eup %635 }
 0x13b   : > { %v638_v33 = vpop.eup %637  ;;  %v364_v34 = vadd.f32 1.0, %v636_v32  ;;  %639 = vpow2.f32 %v606_v31 }
 0x13c   : > { %v383_v35 = vadd.f32 1.0, %v638_v33  ;;  %v338_v36 = vpop.f32.mrf.mxu2 }
 0x13d   : > { %641 = vrcp.f32 %v364_v34  ;;  %v339_v40 = vadd.f32 %v338_v36, %v241_v28  ;;  %v376_v46 = vand.u32 2147483648, %v364_v34  ;;  %v374_v49 = vand.u32 2147483647, %v364_v34 }
 0x13e   : > { %643 = vrcp.f32 %v383_v35  ;;  %v395_v47 = vand.u32 2147483648, %v383_v35  ;;  %v393_v51 = vand.u32 2147483647, %v383_v35  ;;  %vm370_vm4 = vweird.f32 %v364_v34 }
 0x13f   : > { %vm389_vm5 = vweird.f32 %v383_v35  ;;  %v377_v55 = vor.u32 1.1754944e-38, %v376_v46  ;;  %vm375_vm8 = vcmp.eq.f32.partialorder %v374_v49, 8.507059e+37 }
 0x140   : > { %v396_v58 = vor.u32 1.1754944e-38, %v395_v47  ;;  %vm394_vm9 = vcmp.eq.f32.partialorder %v393_v51, 8.507059e+37 }
 0x141   : > { %v640_v37 = vpop.eup %639 }
 0x142   : > { %v403_v38 = vadd.f32 1.0, %v640_v37 }
 0x143   : > { %v642_v39 = vpop.eup %641 }
 0x144   : > { %v644_v41 = vpop.eup %643  ;;  %v366_v42 = vmul.f32 %v642_v39, %v364_v34  ;;  %645 = vrcp.f32 %v403_v38  ;;  %vm371_vm2 = vweird.f32 %v642_v39  ;;  %v415_v11 = vand.u32 2147483648, %v403_v38 }
 0x145   : > { %v385_v43 = vmul.f32 %v644_v41, %v383_v35  ;;  %647 = vtanh.f32 %v339_v40  ;;  %vm390_vm3 = vweird.f32 %v644_v41  ;;  %vm372_vm6 = vmor %vm370_vm4, %vm371_vm2  ;;  %vm409_vm12 = vweird.f32 %v403_v38 }
 0x146   : > { %v367_v44 = vsub.f32 1.0, %v366_v42  ;;  %vm391_vm7 = vmor %vm389_vm5, %vm390_vm3  ;;  %v413_v13 = vand.u32 2147483647, %v403_v38  ;;  %v416_v15 = vor.u32 1.1754944e-38, %v415_v11 }
 0x147   : > { %v386_v45 = vsub.f32 1.0, %v385_v43 }
 0x148   : > { %v368_v48 = vmul.f32 %v642_v39, %v367_v44  ;;  %vm414_vm14 = vcmp.eq.f32.partialorder %v413_v13, 8.507059e+37 }
 0x149   : > { %v387_v50 = vmul.f32 %v644_v41, %v386_v45 }
 0x14a   : > { %v646_v52 = vpop.eup %645  ;;  %v369_v53 = vadd.f32 %v642_v39, %v368_v48 }
 0x14b   : > { %v405_v54 = vmul.f32 %v646_v52, %v403_v38  ;;  %v388_v56 = vadd.f32 %v644_v41, %v387_v50  ;;  %v648_v61 = vpop.eup %647  ;;  %vm410_vm11 = vweird.f32 %v646_v52 }
 0x14c   : > { %v373_v60 = vsel %vm372_vm6, %v642_v39, %v369_v53  ;;  %vm411_vm13 = vmor %vm409_vm12, %vm410_vm11 }
 0x14d   : > { %v406_v63 = vsub.f32 1.0, %v405_v54  ;;  %v378_v0 = vsel %vm375_vm8, %v377_v55, %v373_v60  ;;  %v392_v3 = vsel %vm391_vm7, %v644_v41, %v388_v56 }
 0x14e   : > { %v397_v4 = vsel %vm394_vm9, %v396_v58, %v392_v3  ;;  %v420_v5 = vmul.f32 %v648_v61, %v378_v0 }
 0x14f   : > { %v407_v6 = vmul.f32 %v646_v52, %v406_v63  ;;  %v419_v7 = vmul.f32 %v397_v4, %v107_v59 }
 0x151   : > { %v421_v9 = vadd.f32 %v420_v5, %v419_v7  ;;  %v408_v10 = vadd.f32 %v646_v52, %v407_v6 }
 0x153   : > { %649 = vtanh.f32 %v421_v9  ;;  %v429_v12 = vsel %vm887_vm10, %v421_v9, %v107_v59  ;;  %v412_v14 = vsel %vm411_vm13, %v646_v52, %v408_v10 }
 0x154   : > { %430 = vst [vmem:[#allocation3] sm:$0xff] %v429_v12  ;;  %v417_v17 = vsel %vm414_vm14, %v416_v15, %v412_v14 }
 0x159   : > { %v650_v16 = vpop.eup %649  ;;  %102 = sbr.rel (!%p99_p1) target bundleno = 138 (0x8a), region = 68 }
 0x15a   : > { %v423_v18 = vmul.f32 %v650_v16, %v417_v17 }
 0x15c   : > { %v427_v19 = vsel %vm887_vm10, %v423_v18, %v875_v2 }
 0x15d   : > { %428 = vst [vmem:[#allocation2] sm:$0xff] %v427_v19 }
 0x15e PF:  { %v438_v20 = vld [vmem:[#allocation13 + $0x40] sm:$0x1]  ;;  %vm445_vm15 = vcmask 1040384   ;;  %v440_v21 = vld [vmem:[#allocation13 + $0x58] sm:$0x1]  ;;  %651 = vset.pattern.permute.xlu0 %v809_v1  ;;  %v431_v26 = vld [vmem:[%s918_s5] sm:$0xff] }
 0x15f   :  { %v435_v22 = vld [vmem:[#allocation13 + $0x20] sm:$0xff]  ;;  %607 = vmatpush.msk.msra.mxu0 %vm445_vm15, %v438_v20  ;;  %611 = vmatpush.msk.msra.mxu2 %vm445_vm15, %v440_v21  ;;  %v437_v2 = vld [vmem:[#allocation13 + $0x38] sm:$0xff]  ;;  %v439_v25 = vld [vmem:[#allocation13 + $0x50] sm:$0x1]  ;;  %vm441_vm0 = vcmask 138240   ;;  %s575_s12 = sshll.u32 %s920_s7, 4  ;;  %s576_s12 = int_to_ptr.hbm [resolvable:$true] %s575_s12 }
 0x160   :  { %v432_v23 = vld [vmem:[#allocation13] sm:$0xff]  ;;  %v434_v24 = vld [vmem:[#allocation13 + $0x18] sm:$0xff]  ;;  %v557_v27 = vld [vmem:[%s914_s1] sm:$0xff]  ;;  %609 = vmatpush.msk.msra.mxu1 %vm445_vm15, %v439_v25  ;;  %s810_s1 = smov [#allocation15]  }
 0x161   :  { %469 = vmatpush.msra.mxu0 %v435_v22  ;;  %509 = vmatpush.msra.mxu2 %v437_v2  ;;  %v436_v28 = vld [vmem:[#allocation13 + $0x30] sm:$0xff]  ;;  %vm558_vm1 = vcmp.gt.s32.totalorder %v557_v27, 0  ;;  %s573_s5 = sshll.u32 %s810_s1, 4  ;;  %s574_s5 = int_to_ptr.vmem [resolvable:$true] %s573_s5 }
 0x162   :  { %v559_v29 = vsel %vm558_vm1, 1, %v809_v1  ;;  %v433_v30 = vld [vmem:[#allocation13 + $0x10] sm:$0xff]  ;;  %489 = vmatpush.msra.mxu1 %v436_v28 }
 0x163   :  { %470 = vmatpush.msra.mxu0 %v432_v23  ;;  %510 = vmatpush.msra.mxu2 %v434_v24 }
 0x164   :  { %608 = vmatmul.msk.f32.vlgmr.msra.gmra.mxu0 %vm441_vm0, %v431_v26  ;;  %612 = vmatmul.msk.f32.vlgmr.msra.gmra.mxu2 %vm441_vm0, %v431_v26  ;;  %v565_v35 = vld [vmem:[#allocation2] sm:$0xff] }
 0x165   :  { %561 = vperm.xlu0 %651, %v559_v29   ;;  %490 = vmatpush.msra.mxu1 %v433_v30  ;;  %566 = vst [vmem:[#allocation15] sm:$0xff] %v565_v35 }
 0x166   :  { %610 = vmatmul.msk.f32.vlgmr.msra.gmra.mxu1 %vm441_vm0, %v431_v26 }
 0x1d7   :  { %v562_v59 = vpop.permute.xlu0 %561 }
 0x1d8   :  { %vm563_vm10 = vcmp.eq.s32.totalorder %v562_v59, 1 }
 0x1e1   :  { %v472_v31 = vpop.f32.mrf.mxu0 }
 0x1e2   :  { %v613_v32 = vmul.f32 -1.442695, %v472_v31 }
 0x1e3   :  { %v492_v39 = vpop.f32.mrf.mxu1 }
 0x1e4   :  { %652 = vpow2.f32 %v613_v32 }
 0x1e7   :  { %v512_v33 = vpop.f32.mrf.mxu2 }
 0x1e8   :  { %v614_v34 = vmul.f32 -1.442695, %v512_v33 }
 0x1ea   :  { %v653_v36 = vpop.eup %652  ;;  %654 = vpow2.f32 %v614_v34 }
 0x1eb   :  { %v518_v37 = vadd.f32 1.0, %v653_v36 }
 0x1ed   :  { %656 = vrcp.f32 %v518_v37  ;;  %v530_v43 = vand.u32 2147483648, %v518_v37  ;;  %v528_v45 = vand.u32 2147483647, %v518_v37  ;;  %vm524_vm3 = vweird.f32 %v518_v37 }
 0x1ef   :  { %v531_v50 = vor.u32 1.1754944e-38, %v530_v43  ;;  %vm529_vm5 = vcmp.eq.f32.partialorder %v528_v45, 8.507059e+37 }
 0x1f0   :  { %v655_v38 = vpop.eup %654 }
 0x1f1   :  { %v538_v1 = vadd.f32 1.0, %v655_v38 }
 0x1f3   :  { %v657_v40 = vpop.eup %656  ;;  %658 = vrcp.f32 %v538_v1  ;;  %v550_v57 = vand.u32 2147483648, %v538_v1  ;;  %vm544_vm7 = vweird.f32 %v538_v1  ;;  %v548_v58 = vand.u32 2147483647, %v538_v1 }
 0x1f4   :  { %v520_v41 = vmul.f32 %v657_v40, %v518_v37  ;;  %660 = vtanh.f32 %v492_v39  ;;  %vm525_vm2 = vweird.f32 %v657_v40 }
 0x1f5   :  { %vm526_vm4 = vmor %vm524_vm3, %vm525_vm2  ;;  %v551_v61 = vor.u32 1.1754944e-38, %v550_v57  ;;  %vm549_vm9 = vcmp.eq.f32.partialorder %v548_v58, 8.507059e+37 }
 0x1f6   :  { %v521_v42 = vsub.f32 1.0, %v520_v41 }
 0x1f8   :  { %v522_v44 = vmul.f32 %v657_v40, %v521_v42 }
 0x1f9   :  { %v659_v46 = vpop.eup %658 }
 0x1fa   :  { %v540_v47 = vmul.f32 %v659_v46, %v538_v1  ;;  %v523_v48 = vadd.f32 %v657_v40, %v522_v44  ;;  %v661_v49 = vpop.eup %660  ;;  %vm545_vm6 = vweird.f32 %v659_v46 }
 0x1fb   :  { %vm546_vm8 = vmor %vm544_vm7, %vm545_vm6 }
 0x1fc   :  { %v527_v51 = vsel %vm526_vm4, %v657_v40, %v523_v48  ;;  %v541_v52 = vsub.f32 1.0, %v540_v47 }
 0x1fd   :  { %v532_v53 = vsel %vm529_vm5, %v531_v50, %v527_v51 }
 0x1fe   :  { %v554_v54 = vmul.f32 %v661_v49, %v532_v53  ;;  %v542_v55 = vmul.f32 %v659_v46, %v541_v52 }
 0x200   :  { %662 = vtanh.f32 %v554_v54  ;;  %v543_v56 = vadd.f32 %v659_v46, %v542_v55 }
 0x202   :  { %v547_v60 = vsel %vm546_vm8, %v659_v46, %v543_v56 }
 0x203   :  { %v552_v63 = vsel %vm549_vm9, %v551_v61, %v547_v60 }
 0x206   :  { %v663_v62 = vpop.eup %662 }
 0x207   :  { %v556_v0 = vmul.f32 %v663_v62, %v552_v63 }
 0x209   :  { %v564_v3 = vsel %vm563_vm10, %v556_v0, 0.0 }
 0x20a   :  { %567 = vst [vmem:[#allocation15 + $0x8] sm:$0xff] %v564_v3 }
 0x20b   :  { %578 = dma.vmem_to_hbm [thread:$0]  %s574_s5, 256, %s576_s12, [#allocation9]  }
 0x20c   :  { %794 = dma.done.wait [#allocation9], 256  }
 0x20d   :  { %795 = vsyncadd [#allocation9], 4294967040 }
 0x20e   :  { %583 = vsyncpa [#allocation8], 1 }
 0x20f   :  { %584 = vsyncpa [#allocation11], 1 }
 0x210   :  { %585 = vsyncpa [#allocation14], 1 }
 0x211   :  { %586 = vsyncpa [#allocation9], 1 }

</bundles_post_ra>
